<compile_context>
chip_gen: v6e
topology: v6e:2x2x1
jax: 0.10.0
libtpu: 0.0.40
codegen_flags: <defaults>
</compile_context>

<pallas_src>
import functools

import jax
import jax.numpy as jnp
from jax.experimental import pallas as pl
from jax.experimental.pallas import tpu as pltpu


def _mixup_kernel(img_ref, aug_ref, out_ref, *, lam):
    """img/aug/out: (TB, TN) VMEM tiles. Pure VPU blend; kernel is HBM-bound."""
    x = img_ref[...].astype(jnp.float32)
    a = aug_ref[...].astype(jnp.float32)
    out_ref[...] = (lam * x + (1.0 - lam) * a).astype(out_ref.dtype)


def _row_tile(b, max_tb=32):
    """Row (sublane-ish) tile: full batch if small, else a multiple of 8 dividing B."""
    if b <= max_tb:
        return b
    for t in range(max_tb, 0, -1):
        if t % 8 == 0 and b % t == 0:
            return t
    return b  # rare fallback: whole batch (feature tiling still bounds VMEM)


def _col_tile(n, max_tn=8192):
    """Lane tile: full N if small, else the largest multiple of 128 dividing N."""
    if n <= max_tn:
        return n
    for t in range(max_tn, 0, -128):
        if n % t == 0:
            return t
    return n


def augment_forward(images, augment_images, labels, *, lam=0.7, training=True):
    """JAX/Pallas equivalent of Augment.forward for aug_type='mixup'.

    images, augment_images: (B, C, H, W) float32 or bfloat16 (NCHW)
    labels:                 (B,) int32
    Returns (images_out (2B, C, H, W), labels_out (2B,)).
    """
    if not training:
        return images, labels

    B, C, H, W = images.shape
    N = C * H * W
    assert N % 128 == 0, "flattened feature dim should be lane-aligned"

    img2 = images.reshape(B, N)
    aug2 = augment_images.reshape(B, N)

    tb = _row_tile(B)
    tn = _col_tile(N)
    grid = (B // tb, N // tn)

    mix = pl.pallas_call(
        functools.partial(_mixup_kernel, lam=float(lam)),
        out_shape=jax.ShapeDtypeStruct((B, N), images.dtype),
        grid_spec=pltpu.PrefetchScalarGridSpec(
            num_scalar_prefetch=0,
            grid=grid,
            in_specs=[
                pl.BlockSpec((tb, tn), lambda i, j: (i, j)),   # images
                pl.BlockSpec((tb, tn), lambda i, j: (i, j)),   # augment_images
            ],
            out_specs=pl.BlockSpec((tb, tn), lambda i, j: (i, j)),
        ),
        compiler_params=pltpu.CompilerParams(
            dimension_semantics=("parallel", "parallel"),
            vmem_limit_bytes=64 * 1024 * 1024,
        ),
    )(img2, aug2)

    images_augment = mix.reshape(B, C, H, W)
    # Batch-dim concatenation done at graph level (no HBM->VMEM->HBM identity
    # copy inside the kernel).
    images_out = jnp.concatenate([images, images_augment], axis=0)
    labels_out = jnp.concatenate([labels, labels], axis=0)
    return images_out, labels_out


if __name__ == "__main__":
    key = jax.random.PRNGKey(0)
    k1, k2, k3 = jax.random.split(key, 3)

    B, C, H, W = 2, 4, 16, 16
    images = jax.random.normal(k1, (B, C, H, W), dtype=jnp.float32)
    augment_images = jax.random.normal(k2, (B, C, H, W), dtype=jnp.float32)
    labels = jax.random.randint(k3, (B,), 0, 10, dtype=jnp.int32)

    lam = 0.7
    images_out, labels_out = augment_forward(
        images, augment_images, labels, lam=lam, training=True)
    jax.block_until_ready(images_out)
    jax.block_until_ready(labels_out)

    # Pure-JAX reference check of the forward semantics.
    ref_aug = lam * images + (1.0 - lam) * augment_images
    ref_images = jnp.concatenate([images, ref_aug], axis=0)
    ref_labels = jnp.concatenate([labels, labels], axis=0)
    assert images_out.shape == (2 * B, C, H, W)
    assert labels_out.shape == (2 * B,)
    assert jnp.allclose(images_out, ref_images, atol=1e-6)
    assert jnp.array_equal(labels_out, ref_labels)

    # Eval-mode path passes inputs through unchanged.
    ev_img, ev_lab = augment_forward(
        images, augment_images, labels, lam=lam, training=False)
    assert ev_img.shape == (B, C, H, W) and ev_lab.shape == (B,)

    print("KERNEL_OK")
</pallas_src>

<mosaic_0001>
module attributes {stable_mosaic.version = 11 : i64} {
  func.func @_mixup_kernel(%arg0: i32, %arg1: i32, %arg2: memref<2x1024xf32, #tpu.memory_space<vmem>>, %arg3: memref<2x1024xf32, #tpu.memory_space<vmem>>, %arg4: memref<2x1024xf32, #tpu.memory_space<vmem>>) attributes {dimension_semantics = [#tpu.dimension_semantics<parallel>, #tpu.dimension_semantics<parallel>], iteration_bounds = array<i64: 1, 1>, scalar_prefetch = 0 : i64, scratch_operands = 0 : i64, tpu.core_type = #tpu.core_type<tc>, window_params = [{transform_indices = @transform_0, window_bounds = array<i64: 2, 1024>}, {transform_indices = @transform_1, window_bounds = array<i64: 2, 1024>}, {transform_indices = @transform_2, window_bounds = array<i64: 2, 1024>}]} {
    %c0 = arith.constant 0 : index
    %c0_0 = arith.constant 0 : index
    %0 = vector.load %arg2[%c0, %c0_0] : memref<2x1024xf32, #tpu.memory_space<vmem>>, vector<2x1024xf32>
    %c0_1 = arith.constant 0 : index
    %c0_2 = arith.constant 0 : index
    %1 = vector.load %arg3[%c0_1, %c0_2] : memref<2x1024xf32, #tpu.memory_space<vmem>>, vector<2x1024xf32>
    %cst = arith.constant 0.699999988 : f32
    %2 = vector.broadcast %cst : f32 to vector<2x1024xf32>
    %3 = arith.mulf %2, %0 : vector<2x1024xf32>
    %cst_3 = arith.constant 3.000000e-01 : f32
    %4 = vector.broadcast %cst_3 : f32 to vector<2x1024xf32>
    %5 = arith.mulf %4, %1 : vector<2x1024xf32>
    %6 = arith.addf %3, %5 : vector<2x1024xf32>
    %c0_4 = arith.constant 0 : index
    %c0_5 = arith.constant 0 : index
    %7 = vector.load %arg4[%c0_4, %c0_5] : memref<2x1024xf32, #tpu.memory_space<vmem>>, vector<2x1024xf32>
    tpu.vector_store %arg4[%c0_4, %c0_5], %6 {strides = array<i32>} : memref<2x1024xf32, #tpu.memory_space<vmem>>, vector<2x1024xf32>,
    return
  }
  func.func @transform_0(%arg0: i32, %arg1: i32) -> (i32, i32) {
    %c0_i32 = arith.constant 0 : i32
    return %arg0, %arg1 : i32, i32
  }
  func.func @transform_1(%arg0: i32, %arg1: i32) -> (i32, i32) {
    %c0_i32 = arith.constant 0 : i32
    return %arg0, %arg1 : i32, i32
  }
  func.func @transform_2(%arg0: i32, %arg1: i32) -> (i32, i32) {
    %c0_i32 = arith.constant 0 : i32
    return %arg0, %arg1 : i32, i32
  }
}

</mosaic_0001>

<bundles_post_ra>
// kernel: tpu_custom_call.1
= control target key start
LH: loop header
LB: loop body
LE: loop exit
PB: predicated region body
PF: predicated region fallthrough
CT: control target
= control target key end

     0   :  { %7 = vsyncpa [#allocation3], 0  ;;  %s160_s0 = inlined_call_operand.hbm [shape: f32[2,1024], index: 0, kind: input, shape index: {}]   ;;  %s161_s1 = inlined_call_operand.hbm [shape: f32[2,1024], index: 1, kind: input, shape index: {}]   ;;  %s162_s2 = inlined_call_operand.hbm [shape: f32[2,1024], index: 2, kind: output, shape index: {}]  }
   0x1   :  { %8 = vsyncpa [#allocation6], 0 }
   0x2   :  { %9 = vsyncpa [#allocation4], 0  ;;  %s133_s9 = smov [#allocation2]   ;;  %s134_s11 = smov [#allocation5]  }
   0x3   :  { %s16_s10 = sshll.u32 %s133_s9, 4  ;;  %s26_s12 = sshll.u32 %s134_s11, 4  ;;  %s17_s10 = int_to_ptr.vmem [resolvable:$true] %s16_s10  ;;  %s27_s12 = int_to_ptr.vmem [resolvable:$true] %s26_s12 }
   0x4   :  { %s75_s13 = scalar_lea.vmem %s17_s10, 256  ;;  %p80_p1 = scmp.lt.s32.totalorder %s17_s10, %s17_s10 }
   0x5   :  { %p76_p0 = scmp.ne.s32.totalorder %s17_s10, %s75_s13  ;;  %p81_p2 = scmp.lt.s32.totalorder %s75_s13, %s75_s13 }
   0x7   :  { %p82_p3 = por %p81_p2, %p80_p1 }
   0x9   :  { %p83_p4 = pnand %p82_p3, %p76_p0 }
   0xb   :  { %86 = shalt.err (!%p83_p4)
}
   0xc   :  { %19 = dma.hbm_to_vmem [thread:$0]  %s160_s0, 256, %s17_s10, [#allocation3]  }
   0xd   :  { %s95_s16 = scalar_lea.vmem %s27_s12, 256  ;;  %p100_p6 = scmp.lt.s32.totalorder %s27_s12, %s27_s12 }
   0xe   :  { %p96_p5 = scmp.ne.s32.totalorder %s27_s12, %s95_s16  ;;  %p101_p7 = scmp.lt.s32.totalorder %s95_s16, %s95_s16 }
  0x10   :  { %p102_p8 = por %p101_p7, %p100_p6 }
  0x12   :  { %p103_p9 = pnand %p102_p8, %p96_p5 }
  0x14   :  { %106 = shalt.err (!%p103_p9)
}
  0x15   :  { %29 = dma.hbm_to_vmem [thread:$0]  %s161_s1, 256, %s27_s12, [#allocation6]  }
  0x16   :  { %127 = dma.done.wait [#allocation3], 256  }
  0x17   :  { %128 = vsyncadd [#allocation3], 4294967040 }
  0x18   :  { %129 = dma.done.wait [#allocation6], 256  }
  0x19   :  { %130 = vsyncadd [#allocation6], 4294967040  ;;  %v36_v0 = vld [vmem:[#allocation2] sm:$0xff]  ;;  %v38_v1 = vld [vmem:[#allocation5] sm:$0xff]  ;;  %s135_s0 = smov [#allocation7]  }
  0x1a   :  { %v37_v2 = vld [vmem:[#allocation2 + $0x8] sm:$0xff]  ;;  %v40_v3 = vmul.f32 0.7, %v36_v0  ;;  %v42_v4 = vmul.f32 0.3, %v38_v1  ;;  %v39_v5 = vld [vmem:[#allocation5 + $0x8] sm:$0xff] }
  0x1b   :  { %s54_s19 = sshll.u32 %s135_s0, 4  ;;  %v41_v6 = vmul.f32 0.7, %v37_v2  ;;  %v43_v7 = vmul.f32 0.3, %v39_v5  ;;  %s55_s19 = int_to_ptr.vmem [resolvable:$true] %s54_s19 }
  0x1c   :  { %v44_v8 = vadd.f32 %v42_v4, %v40_v3  ;;  %s107_s1 = scalar_lea.vmem %s55_s19, 256  ;;  %p112_p11 = scmp.lt.s32.totalorder %s55_s19, %s55_s19 }
  0x1d   :  { %v45_v9 = vadd.f32 %v43_v7, %v41_v6  ;;  %p108_p10 = scmp.ne.s32.totalorder %s55_s19, %s107_s1  ;;  %p113_p12 = scmp.lt.s32.totalorder %s107_s1, %s107_s1 }
  0x1e   :  { %46 = vst [vmem:[#allocation7] sm:$0xff] %v44_v8 }
  0x1f   :  { %47 = vst [vmem:[#allocation7 + $0x8] sm:$0xff] %v45_v9  ;;  %p114_p13 = por %p113_p12, %p112_p11 }
  0x21   :  { %p115_p0 = pnand %p114_p13, %p108_p10 }
  0x23   :  { %118 = shalt.err (!%p115_p0)
}
  0x24   :  { %57 = dma.vmem_to_hbm [thread:$0]  %s55_s19, 256, %s162_s2, [#allocation4]  }
  0x25   :  { %131 = dma.done.wait [#allocation4], 256  }
  0x26   :  { %132 = vsyncadd [#allocation4], 4294967040 }
  0x27   :  { %61 = vsyncpa [#allocation3], 1 }
  0x28   :  { %62 = vsyncpa [#allocation6], 1 }
  0x29   :  { %63 = vsyncpa [#allocation4], 1 }

</bundles_post_ra>
